<compile_context>
chip_gen: v7x
topology: tpu7x:2x2x1
jax: 0.10.0
libtpu: 0.0.40
codegen_flags: <defaults>
</compile_context>

<pallas_src>
import jax
import jax.numpy as jnp
import numpy as np
from jax.experimental import pallas as pl
from jax.experimental.pallas import tpu as pltpu

CLS_ID = 101   # bert-base-uncased [CLS]
SEP_ID = 102   # bert-base-uncased [SEP]
PAD_ID = 0     # bert-base-uncased [PAD]

# TODO(synk): the HuggingFace WordPiece string tokenization itself has no
# Pallas/tensor equivalent; the kernel consumes pre-tokenized wordpiece ids.


def _make_pad_kernel(body_cap: int):
    """body_cap = max_length - 2 (max number of body tokens per row)."""

    def kernel(tok_ref, len_ref, out_ref):
        toks = tok_ref[...]                      # [TB, Lp] ids, pre-shifted to col 1
        lens = len_ref[...]                      # [TB, 1]  clamped valid lengths
        TB, Lp = out_ref.shape

        # position index along the sequence (lane) axis
        pos = jax.lax.broadcasted_iota(jnp.int32, (TB, Lp), 1)

        # defensive clamp (wrapper already clamps): room for [CLS] and [SEP]
        n_keep = jnp.minimum(lens, body_cap)     # [TB, 1]

        out = jnp.where((pos >= 1) & (pos <= n_keep), toks, PAD_ID)
        out = jnp.where(pos == 0, CLS_ID, out)
        out = jnp.where(pos == n_keep + 1, SEP_ID, out)
        out_ref[...] = out

    return kernel


def bert_tokenizer_forward(raw_tokens, lengths, max_length=77, block_rows=None,
                           lane_dense=False):
    """Pallas equivalent of BERTTokenizer.forward on pre-tokenized ids.

    raw_tokens: [B, L] int32 wordpiece ids (un-truncated, un-padded tail junk ok)
    lengths:    [B]    int32 number of valid wordpiece ids per row
    returns:    [B, max_length] int32 input_ids
                (or the lane-dense [B, round_up(max_length,128)] buffer if
                 lane_dense=True, letting the consumer skip the slice copy)
    """
    B, L = raw_tokens.shape
    body_cap = max_length - 2                      # body tokens per row
    Lp = ((max_length + 127) // 128) * 128         # lane-aligned working width
    keep = min(L, body_cap)                        # columns of raw input we need

    # batch tile size: multiple of 8 sublanes, capped so the double-buffered
    # in+out footprint stays a few MiB (safe for v7x's smaller VMEM too).
    if block_rows is None:
        block_rows = min(max(((B + 7) // 8) * 8, 8), 1024)
    TB = block_rows
    Bp = ((B + TB - 1) // TB) * TB                 # padded batch rows

    # Single pad op: tokens land at column offset 1 (folds the [CLS] shift),
    # only the first `keep` raw columns are ever read.
    toks = jnp.zeros((Bp, Lp), jnp.int32)
    toks = toks.at[:B, 1:1 + keep].set(raw_tokens[:, :keep].astype(jnp.int32))

    # clamp lengths to what is actually available / fits after truncation
    lens = jnp.minimum(lengths.astype(jnp.int32), keep).reshape(B, 1)
    lens = jnp.zeros((Bp, 1), jnp.int32).at[:B, :].set(lens)

    grid = (Bp // TB,)
    out = pl.pallas_call(
        _make_pad_kernel(body_cap),
        out_shape=jax.ShapeDtypeStruct((Bp, Lp), jnp.int32),
        grid=grid,
        in_specs=[
            pl.BlockSpec((TB, Lp), lambda i: (i, 0)),   # token ids, VMEM
            pl.BlockSpec((TB, 1), lambda i: (i, 0)),    # lengths, VMEM
        ],
        out_specs=pl.BlockSpec((TB, Lp), lambda i: (i, 0)),
        compiler_params=pltpu.CompilerParams(
            dimension_semantics=("parallel",)),
    )(toks, lens)

    if lane_dense:
        return out[:B]                 # consumer ignores the PAD tail lanes
    return out[:B, :max_length]


def _reference(raw_tokens, lengths, max_length):
    raw = np.asarray(raw_tokens)
    lens = np.asarray(lengths)
    B = raw.shape[0]
    out = np.full((B, max_length), PAD_ID, np.int32)
    for i in range(B):
        n = min(int(lens[i]), max_length - 2, raw.shape[1])
        out[i, 0] = CLS_ID
        out[i, 1:1 + n] = raw[i, :n]
        out[i, 1 + n] = SEP_ID
    return out


if __name__ == "__main__":
    key = jax.random.PRNGKey(0)
    k_tok, _ = jax.random.split(key)

    B = 2
    MAX_LENGTH = 77
    L_RAW = 90  # longer than max_length so truncation is exercised

    # deterministic synthetic wordpiece ids (vocab 30522, avoid special ids)
    raw_tokens = jax.random.randint(k_tok, (B, L_RAW), 1000, 30522, dtype=jnp.int32)
    lengths = jnp.array([5, 90], dtype=jnp.int32)  # one short row, one truncated row

    out = bert_tokenizer_forward(raw_tokens, lengths, max_length=MAX_LENGTH)
    out = jax.block_until_ready(out)

    ref = _reference(raw_tokens, lengths, MAX_LENGTH)
    np.testing.assert_array_equal(np.asarray(out), ref)

    print("KERNEL_OK")
</pallas_src>

<mosaic_0001>
module attributes {stable_mosaic.version = 11 : i64} {
  func.func @kernel(%arg0: i32, %arg1: memref<8x128xi32, #tpu.memory_space<vmem>>, %arg2: memref<8x1xi32, #tpu.memory_space<vmem>>, %arg3: memref<8x128xi32, #tpu.memory_space<vmem>>) attributes {dimension_semantics = [#tpu.dimension_semantics<parallel>], iteration_bounds = array<i64: 1>, scalar_prefetch = 0 : i64, scratch_operands = 0 : i64, tpu.core_type = #tpu.core_type<tc>, window_params = [{transform_indices = @transform_0, window_bounds = array<i64: 8, 128>}, {transform_indices = @transform_1, window_bounds = array<i64: 8, 1>}, {transform_indices = @transform_2, window_bounds = array<i64: 8, 128>}]} {
    %c0 = arith.constant 0 : index
    %c0_0 = arith.constant 0 : index
    %0 = vector.load %arg1[%c0, %c0_0] : memref<8x128xi32, #tpu.memory_space<vmem>>, vector<8x128xi32>
    %c0_1 = arith.constant 0 : index
    %c0_2 = arith.constant 0 : index
    %1 = vector.load %arg2[%c0_1, %c0_2] : memref<8x1xi32, #tpu.memory_space<vmem>>, vector<8x1xi32>
    %2 = tpu.iota {dimensions = array<i32: 1>} : vector<8x128xi32>
    %c75_i32 = arith.constant 75 : i32
    %3 = vector.broadcast %c75_i32 : i32 to vector<8x1xi32>
    %4 = arith.minsi %1, %3 : vector<8x1xi32>
    %c1_i32 = arith.constant 1 : i32
    %5 = vector.broadcast %c1_i32 : i32 to vector<8x128xi32>
    %6 = arith.cmpi sge, %2, %5 : vector<8x128xi32>
    %7 = vector.broadcast %4 : vector<8x1xi32> to vector<8x128xi32>
    %8 = arith.cmpi sle, %2, %7 : vector<8x128xi32>
    %9 = arith.andi %6, %8 : vector<8x128xi1>
    %c0_i32 = arith.constant 0 : i32
    %10 = vector.broadcast %c0_i32 : i32 to vector<8x128xi32>
    %11 = arith.select %9, %0, %10 : vector<8x128xi1>, vector<8x128xi32>
    %c0_i32_3 = arith.constant 0 : i32
    %12 = vector.broadcast %c0_i32_3 : i32 to vector<8x128xi32>
    %13 = arith.cmpi eq, %2, %12 : vector<8x128xi32>
    %c101_i32 = arith.constant 101 : i32
    %14 = vector.broadcast %c101_i32 : i32 to vector<8x128xi32>
    %15 = arith.select %13, %14, %11 : vector<8x128xi1>, vector<8x128xi32>
    %c1_i32_4 = arith.constant 1 : i32
    %16 = vector.broadcast %c1_i32_4 : i32 to vector<8x1xi32>
    %17 = arith.addi %4, %16 : vector<8x1xi32>
    %18 = vector.broadcast %17 : vector<8x1xi32> to vector<8x128xi32>
    %19 = arith.cmpi eq, %2, %18 : vector<8x128xi32>
    %c102_i32 = arith.constant 102 : i32
    %20 = vector.broadcast %c102_i32 : i32 to vector<8x128xi32>
    %21 = arith.select %19, %20, %15 : vector<8x128xi1>, vector<8x128xi32>
    %c0_5 = arith.constant 0 : index
    %c0_6 = arith.constant 0 : index
    %22 = vector.load %arg3[%c0_5, %c0_6] : memref<8x128xi32, #tpu.memory_space<vmem>>, vector<8x128xi32>
    tpu.vector_store %arg3[%c0_5, %c0_6], %21 {strides = array<i32>} : memref<8x128xi32, #tpu.memory_space<vmem>>, vector<8x128xi32>,
    return
  }
  func.func @transform_0(%arg0: i32) -> (i32, i32) {
    %c0_i32 = arith.constant 0 : i32
    %c0_i32_0 = arith.constant 0 : i32
    return %arg0, %c0_i32 : i32, i32
  }
  func.func @transform_1(%arg0: i32) -> (i32, i32) {
    %c0_i32 = arith.constant 0 : i32
    %c0_i32_0 = arith.constant 0 : i32
    return %arg0, %c0_i32 : i32, i32
  }
  func.func @transform_2(%arg0: i32) -> (i32, i32) {
    %c0_i32 = arith.constant 0 : i32
    %c0_i32_0 = arith.constant 0 : i32
    return %arg0, %c0_i32 : i32, i32
  }
}

</mosaic_0001>

<bundles_post_ra>
// kernel: tpu_custom_call.1
= control target key start
LH: loop header
LB: loop body
LE: loop exit
PB: predicated region body
PF: predicated region fallthrough
CT: control target
= control target key end

     0   :  { %s110_s0 = inlined_call_operand.vmem [shape: s32[8,128], index: 0, kind: input, shape index: {}]   ;;  %s111_s1 = inlined_call_operand.vmem [shape: s32[8,1], index: 1, kind: input, shape index: {}]   ;;  %s112_s2 = inlined_call_operand.hbm [shape: s32[8,128], index: 2, kind: output, shape index: {}]  }
   0x1   :  { %v13_v0 = vld [vmem:[%s111_s1] sm:$0xff] }
   0x2   :  { %7 = vsyncpa [#allocation3], 0  ;;  %v75_v1 = vmov 0   ;;  %vm16_vm0 = vcmp.lt.s32.totalorder %v13_v0, 75  ;;  %v14_v4 = vlaneseq  ;;  %v12_v7 = vld [vmem:[%s110_s0] sm:$0xff]  ;;  %s76_s1 = smov [#allocation2]  }
   0x3   :  { %50 = vset.pattern.permute.xlu0 %v75_v1  ;;  %v17_v2 = vsel %vm16_vm0, %v13_v0, 75  ;;  %s40_s13 = sshll.u32 %s76_s1, 4  ;;  %s41_s13 = int_to_ptr.vmem [resolvable:$true] %s40_s13 }
   0x4   :  { %20 = vperm.xlu0 %50, %v17_v2   ;;  %v27_v3 = vadd.s32 1, %v17_v2  ;;  %v15_v5 = vand.u32 127, %v14_v4  ;;  %s51_s14 = scalar_lea.vmem %s41_s13, 128  ;;  %p56_p1 = scmp.lt.s32.totalorder %s41_s13, %s41_s13 }
   0x5   :  { %p52_p0 = scmp.ne.s32.totalorder %s41_s13, %s51_s14  ;;  %p57_p2 = scmp.lt.s32.totalorder %s51_s14, %s51_s14 }
   0x6   :  { %vm18_vm1 = vcmp.ge.s32.totalorder %v15_v5, 1  ;;  %vm25_vm3 = vcmp.eq.s32.totalorder %v15_v5, 0 }
   0x7   :  { %p58_p3 = por %p57_p2, %p56_p1 }
   0x8   :  { %29 = vperm.xlu0 %50, %v27_v3  }
   0x9   :  { %p59_p4 = pnand %p58_p3, %p52_p0 }
  0x83   :  { %v21_v6 = vpop.permute.xlu0 %20 }
  0x84   :  { %vm22_vm2 = vcmp.le.s32.totalorder %v15_v5, %v21_v6 }
  0x85   :  { %vm23_vm4 = vmand %vm18_vm1, %vm22_vm2 }
  0x86   :  { %v24_v8 = vsel %vm23_vm4, %v12_v7, 0 }
  0x87   :  { %v30_v9 = vpop.permute.xlu0 %29  ;;  %v26_v10 = vsel %vm25_vm3, 101, %v24_v8 }
  0x88   :  { %vm31_vm5 = vcmp.eq.s32.totalorder %v15_v5, %v30_v9 }
  0x89   :  { %v32_v11 = vsel %vm31_vm5, 102, %v26_v10 }
  0x8a   :  { %33 = vst [vmem:[#allocation2] sm:$0xff] %v32_v11 }
  0x8b   :  { %62 = shalt.err (!%p59_p4)
}
  0x8c   :  { %s63_s16 = scalar_lea.hbm %s112_s2, 128 }
  0x8d   :  { %p64_p5 = scmp.ne.s32.totalorder %s112_s2, %s63_s16  ;;  %p67_p6 = scmp.lt.u32.totalorder %s63_s16, %s112_s2 }
  0x8f   :  { %p69_p7 = pnand %p67_p6, %p64_p5 }
  0x91   :  { %72 = shalt.err (!%p69_p7)
}
  0x92   :  { %43 = dma.vmem_to_hbm [thread:$0]  %s41_s13, 128, %s112_s2, [#allocation3]  }
  0x93   :  { %73 = dma.done.wait [#allocation3], 128  }
  0x94   :  { %74 = vsyncadd [#allocation3], 4294967168 }
  0x95   :  { %47 = vsyncpa [#allocation3], 1 }

</bundles_post_ra>
